<compile_context>
chip_gen: v6e
topology: v6e:2x2x1
jax: 0.10.0
libtpu: 0.0.40
codegen_flags: <defaults>
</compile_context>

<pallas_src>
import functools
import math

import jax
import jax.numpy as jnp
from jax.experimental import pallas as pl
from jax.experimental.pallas import tpu as pltpu


def _round_up(n, m):
    return ((n + m - 1) // m) * m


def _int_pow(u, p):
    """u**p for static integer p >= 1 via square-and-multiply (VALU only)."""
    assert p >= 1
    result = None
    base = u
    while p > 0:
        if p & 1:
            result = base if result is None else result * base
        p >>= 1
        if p:
            base = base * base
    return result


def _radial_embedding_kernel(x_ref, o_ref, *, r_cutoff, p, prefactor, n_basis):
    # x_ref: (8, L) f32            -- edges packed over all 8 sublanes, L lanes
    # o_ref: (n_basis, 8, L)       -- basis-major; edges dense in (sublane, lane)
    x = x_ref[...]                                   # (8, L)

    inv_rc = 1.0 / r_cutoff
    u = x * inv_rc

    # --- polynomial cutoff envelope (Horner form):
    #     env = 1 - c1*u^p + c2*u^(p+1) - c3*u^(p+2)
    #         = 1 + u^p * (-c1 + u*(c2 - c3*u))
    pf = float(p)
    c1 = (pf + 1.0) * (pf + 2.0) / 2.0
    c2 = pf * (pf + 2.0)
    c3 = pf * (pf + 1.0) / 2.0
    u_p = _int_pow(u, p)
    env = 1.0 + u_p * (-c1 + u * (c2 - c3 * u))
    mask = (x < r_cutoff).astype(x.dtype)

    # --- single per-edge scale: prefactor * env * mask / x  (exact divide once
    #     per edge; kernel is mem-bound after dense packing, so no approx recip)
    scale = (prefactor * env * mask) / x             # (8, L)

    # --- sin(k*theta) via Chebyshev three-term recurrence:
    #     theta = pi*x/r_c, s_k = sin(k*theta), s_{k+1} = 2*cos(theta)*s_k - s_{k-1}
    # Each basis row is written straight to o_ref (no concat, minimal live state).
    theta = (math.pi * inv_rc) * x
    s_cur = jnp.sin(theta)                           # EUP
    two_c = 2.0 * jnp.cos(theta)                     # EUP
    o_ref[0] = (s_cur * scale).astype(o_ref.dtype)
    s_prev = jnp.zeros_like(s_cur)
    for k in range(1, n_basis):
        s_next = two_c * s_cur - s_prev              # VALU
        o_ref[k] = (s_next * scale).astype(o_ref.dtype)
        s_prev, s_cur = s_cur, s_next


def radial_embedding(x, *, r_cutoff, n_basis, n_polynomial_cutoff,
                     target_edges_per_tile=65536,
                     out_dtype=jnp.float32,
                     transpose_out=True):
    """x: (N, 1) or (N,) float32 distances -> (N, n_basis) embeddings.

    transpose_out=False returns the (n_basis, N) kernel-native layout so a
    downstream dot_general can contract the basis axis without an extra
    HBM-round-trip transpose.
    """
    x = jnp.asarray(x, jnp.float32)
    if x.ndim == 2 and x.shape[-1] == 1:
        x_flat = x[:, 0]
    else:
        x_flat = x.reshape(-1)
    n = x_flat.shape[0]

    # --- tile selection: edges per tile is a multiple of 8*128 = 1024 (full
    #     (sublane, lane) tiles).  Cap at 128K edges so the double-buffered
    #     in+out blocks (~9 MiB) fit v5e's 16 MiB scoped-VMEM default; no forced
    #     grid split for single-tile inputs (pure overhead on single-TC chips).
    EDGE_ALIGN = 8 * 128
    target = min(
        max(EDGE_ALIGN, _round_up(int(target_edges_per_tile), EDGE_ALIGN)),
        128 * 1024,
    )
    n_pad = _round_up(n, EDGE_ALIGN)
    tile_e = min(target, n_pad)
    n_pad = _round_up(n, tile_e)
    grid_len = n_pad // tile_e
    lane_w = tile_e // 8                 # lanes per block (multiple of 128)
    rows_total = n_pad // lane_w         # = 8 * grid_len

    # Pad with x = 2*r_cutoff: cutoff mask is exactly 0 there -> padded outputs
    # are 0 (no NaN from sin(0)/0), and they get sliced off anyway.
    pad = n_pad - n
    x_padded = jnp.pad(x_flat, (0, pad), constant_values=2.0 * float(r_cutoff))
    x2d = x_padded.reshape(rows_total, lane_w)

    kernel = functools.partial(
        _radial_embedding_kernel,
        r_cutoff=float(r_cutoff),
        p=int(n_polynomial_cutoff),
        prefactor=float(math.sqrt(2.0 / r_cutoff)),
        n_basis=int(n_basis),
    )

    out = pl.pallas_call(
        kernel,
        out_shape=jax.ShapeDtypeStruct((n_basis, rows_total, lane_w), out_dtype),
        grid_spec=pltpu.PrefetchScalarGridSpec(
            num_scalar_prefetch=0,
            grid=(grid_len,),
            in_specs=[
                pl.BlockSpec((8, lane_w), lambda i: (i, 0)),
            ],
            out_specs=pl.BlockSpec((n_basis, 8, lane_w), lambda i: (0, i, 0)),
        ),
        compiler_params=pltpu.CompilerParams(
            dimension_semantics=("parallel",),
        ),
    )(x2d)

    out = out.reshape(n_basis, n_pad)[:, :n]     # (n_basis, N), kernel-native
    if transpose_out:
        return out.T                             # PyTorch layout (N, n_basis)
    return out


def _reference(x, *, r_cutoff, n_basis, n_polynomial_cutoff):
    """Pure-JAX reference mirroring the PyTorch module (direct sins, no recurrence)."""
    x = jnp.asarray(x, jnp.float32).reshape(-1, 1)
    w = (math.pi / r_cutoff) * jnp.linspace(
        1.0, float(n_basis), n_basis, dtype=jnp.float32).reshape(1, n_basis)
    prefactor = math.sqrt(2.0 / r_cutoff)
    radial = prefactor * jnp.sin(w * x) / x
    p = float(n_polynomial_cutoff)
    u = x / r_cutoff
    env = (1.0
           - (p + 1.0) * (p + 2.0) / 2.0 * u ** p
           + p * (p + 2.0) * u ** (p + 1)
           - p * (p + 1.0) / 2.0 * u ** (p + 2))
    cutoff = env * (x < r_cutoff)
    return radial * cutoff


if __name__ == "__main__":
    r_cutoff = 5.0
    n_basis = 8
    n_polynomial_cutoff = 6

    key = jax.random.PRNGKey(0)
    N = 256  # number of edges (distances)
    # distances in (0.1, 1.2*r_cutoff) so both sides of the cutoff are exercised
    x = jax.random.uniform(key, (N, 1), dtype=jnp.float32,
                           minval=0.1, maxval=1.2 * r_cutoff)

    out = radial_embedding(x, r_cutoff=r_cutoff, n_basis=n_basis,
                           n_polynomial_cutoff=n_polynomial_cutoff)
    out = jax.block_until_ready(out)

    ref = _reference(x, r_cutoff=r_cutoff, n_basis=n_basis,
                     n_polynomial_cutoff=n_polynomial_cutoff)
    assert out.shape == (N, n_basis)
    # Tolerance accounts for f32 rounding in the sin(k*theta) recurrence.
    assert jnp.max(jnp.abs(out - ref)) < 2e-5

    print("KERNEL_OK")
</pallas_src>

<mosaic_0001>
module attributes {stable_mosaic.version = 11 : i64} {
  func.func @_radial_embedding_kernel(%arg0: i32, %arg1: memref<8x128xf32, #tpu.memory_space<vmem>>, %arg2: memref<8x8x128xf32, #tpu.memory_space<vmem>>) attributes {dimension_semantics = [#tpu.dimension_semantics<parallel>], iteration_bounds = array<i64: 1>, scalar_prefetch = 0 : i64, scratch_operands = 0 : i64, tpu.core_type = #tpu.core_type<tc>, window_params = [{transform_indices = @transform_0, window_bounds = array<i64: 8, 128>}, {transform_indices = @transform_1, window_bounds = array<i64: 8, 8, 128>}]} {
    %c0 = arith.constant 0 : index
    %c0_0 = arith.constant 0 : index
    %0 = vector.load %arg1[%c0, %c0_0] : memref<8x128xf32, #tpu.memory_space<vmem>>, vector<8x128xf32>
    %cst = arith.constant 2.000000e-01 : f32
    %1 = vector.broadcast %cst : f32 to vector<8x128xf32>
    %2 = arith.mulf %0, %1 : vector<8x128xf32>
    %3 = arith.mulf %2, %2 : vector<8x128xf32>
    %4 = arith.mulf %3, %3 : vector<8x128xf32>
    %5 = arith.mulf %3, %4 : vector<8x128xf32>
    %cst_1 = arith.constant 2.100000e+01 : f32
    %6 = vector.broadcast %cst_1 : f32 to vector<8x128xf32>
    %7 = arith.mulf %6, %2 : vector<8x128xf32>
    %cst_2 = arith.constant 4.800000e+01 : f32
    %8 = vector.broadcast %cst_2 : f32 to vector<8x128xf32>
    %9 = arith.subf %8, %7 : vector<8x128xf32>
    %10 = arith.mulf %2, %9 : vector<8x128xf32>
    %cst_3 = arith.constant -2.800000e+01 : f32
    %11 = vector.broadcast %cst_3 : f32 to vector<8x128xf32>
    %12 = arith.addf %11, %10 : vector<8x128xf32>
    %13 = arith.mulf %5, %12 : vector<8x128xf32>
    %cst_4 = arith.constant 1.000000e+00 : f32
    %14 = vector.broadcast %cst_4 : f32 to vector<8x128xf32>
    %15 = arith.addf %14, %13 : vector<8x128xf32>
    %cst_5 = arith.constant 5.000000e+00 : f32
    %16 = vector.broadcast %cst_5 : f32 to vector<8x128xf32>
    %17 = arith.cmpf olt, %0, %16 : vector<8x128xf32>
    %18 = arith.extui %17 : vector<8x128xi1> to vector<8x128xi32>
    %19 = arith.sitofp %18 : vector<8x128xi32> to vector<8x128xf32>
    %cst_6 = arith.constant 0.632455527 : f32
    %20 = vector.broadcast %cst_6 : f32 to vector<8x128xf32>
    %21 = arith.mulf %20, %15 : vector<8x128xf32>
    %22 = arith.mulf %21, %19 : vector<8x128xf32>
    %23 = arith.divf %22, %0 : vector<8x128xf32>
    %cst_7 = arith.constant 0.628318548 : f32
    %24 = vector.broadcast %cst_7 : f32 to vector<8x128xf32>
    %25 = arith.mulf %24, %0 : vector<8x128xf32>
    %26 = math.sin %25 : vector<8x128xf32>
    %27 = math.cos %25 : vector<8x128xf32>
    %cst_8 = arith.constant 2.000000e+00 : f32
    %28 = vector.broadcast %cst_8 : f32 to vector<8x128xf32>
    %29 = arith.mulf %28, %27 : vector<8x128xf32>
    %30 = arith.mulf %26, %23 : vector<8x128xf32>
    %c0_9 = arith.constant 0 : index
    %c0_10 = arith.constant 0 : index
    %c0_11 = arith.constant 0 : index
    %31 = vector.load %arg2[%c0_9, %c0_10, %c0_11] : memref<8x8x128xf32, #tpu.memory_space<vmem>>, vector<1x8x128xf32>
    %32 = vector.shape_cast %31 : vector<1x8x128xf32> to vector<8x128xf32>
    %33 = vector.shape_cast %30 : vector<8x128xf32> to vector<1x8x128xf32>
    tpu.vector_store %arg2[%c0_9, %c0_10, %c0_11], %33 {strides = array<i32>} : memref<8x8x128xf32, #tpu.memory_space<vmem>>, vector<1x8x128xf32>,
    %cst_12 = arith.constant 0.000000e+00 : f32
    %34 = vector.broadcast %cst_12 : f32 to vector<8x128xf32>
    %35 = arith.mulf %29, %26 : vector<8x128xf32>
    %36 = arith.subf %35, %34 : vector<8x128xf32>
    %37 = arith.mulf %36, %23 : vector<8x128xf32>
    %c1 = arith.constant 1 : index
    %c0_13 = arith.constant 0 : index
    %c0_14 = arith.constant 0 : index
    %38 = vector.load %arg2[%c1, %c0_13, %c0_14] : memref<8x8x128xf32, #tpu.memory_space<vmem>>, vector<1x8x128xf32>
    %39 = vector.shape_cast %38 : vector<1x8x128xf32> to vector<8x128xf32>
    %40 = vector.shape_cast %37 : vector<8x128xf32> to vector<1x8x128xf32>
    tpu.vector_store %arg2[%c1, %c0_13, %c0_14], %40 {strides = array<i32>} : memref<8x8x128xf32, #tpu.memory_space<vmem>>, vector<1x8x128xf32>,
    %41 = arith.mulf %29, %36 : vector<8x128xf32>
    %42 = arith.subf %41, %26 : vector<8x128xf32>
    %43 = arith.mulf %42, %23 : vector<8x128xf32>
    %c2 = arith.constant 2 : index
    %c0_15 = arith.constant 0 : index
    %c0_16 = arith.constant 0 : index
    %44 = vector.load %arg2[%c2, %c0_15, %c0_16] : memref<8x8x128xf32, #tpu.memory_space<vmem>>, vector<1x8x128xf32>
    %45 = vector.shape_cast %44 : vector<1x8x128xf32> to vector<8x128xf32>
    %46 = vector.shape_cast %43 : vector<8x128xf32> to vector<1x8x128xf32>
    tpu.vector_store %arg2[%c2, %c0_15, %c0_16], %46 {strides = array<i32>} : memref<8x8x128xf32, #tpu.memory_space<vmem>>, vector<1x8x128xf32>,
    %47 = arith.mulf %29, %42 : vector<8x128xf32>
    %48 = arith.subf %47, %36 : vector<8x128xf32>
    %49 = arith.mulf %48, %23 : vector<8x128xf32>
    %c3 = arith.constant 3 : index
    %c0_17 = arith.constant 0 : index
    %c0_18 = arith.constant 0 : index
    %50 = vector.load %arg2[%c3, %c0_17, %c0_18] : memref<8x8x128xf32, #tpu.memory_space<vmem>>, vector<1x8x128xf32>
    %51 = vector.shape_cast %50 : vector<1x8x128xf32> to vector<8x128xf32>
    %52 = vector.shape_cast %49 : vector<8x128xf32> to vector<1x8x128xf32>
    tpu.vector_store %arg2[%c3, %c0_17, %c0_18], %52 {strides = array<i32>} : memref<8x8x128xf32, #tpu.memory_space<vmem>>, vector<1x8x128xf32>,
    %53 = arith.mulf %29, %48 : vector<8x128xf32>
    %54 = arith.subf %53, %42 : vector<8x128xf32>
    %55 = arith.mulf %54, %23 : vector<8x128xf32>
    %c4 = arith.constant 4 : index
    %c0_19 = arith.constant 0 : index
    %c0_20 = arith.constant 0 : index
    %56 = vector.load %arg2[%c4, %c0_19, %c0_20] : memref<8x8x128xf32, #tpu.memory_space<vmem>>, vector<1x8x128xf32>
    %57 = vector.shape_cast %56 : vector<1x8x128xf32> to vector<8x128xf32>
    %58 = vector.shape_cast %55 : vector<8x128xf32> to vector<1x8x128xf32>
    tpu.vector_store %arg2[%c4, %c0_19, %c0_20], %58 {strides = array<i32>} : memref<8x8x128xf32, #tpu.memory_space<vmem>>, vector<1x8x128xf32>,
    %59 = arith.mulf %29, %54 : vector<8x128xf32>
    %60 = arith.subf %59, %48 : vector<8x128xf32>
    %61 = arith.mulf %60, %23 : vector<8x128xf32>
    %c5 = arith.constant 5 : index
    %c0_21 = arith.constant 0 : index
    %c0_22 = arith.constant 0 : index
    %62 = vector.load %arg2[%c5, %c0_21, %c0_22] : memref<8x8x128xf32, #tpu.memory_space<vmem>>, vector<1x8x128xf32>
    %63 = vector.shape_cast %62 : vector<1x8x128xf32> to vector<8x128xf32>
    %64 = vector.shape_cast %61 : vector<8x128xf32> to vector<1x8x128xf32>
    tpu.vector_store %arg2[%c5, %c0_21, %c0_22], %64 {strides = array<i32>} : memref<8x8x128xf32, #tpu.memory_space<vmem>>, vector<1x8x128xf32>,
    %65 = arith.mulf %29, %60 : vector<8x128xf32>
    %66 = arith.subf %65, %54 : vector<8x128xf32>
    %67 = arith.mulf %66, %23 : vector<8x128xf32>
    %c6 = arith.constant 6 : index
    %c0_23 = arith.constant 0 : index
    %c0_24 = arith.constant 0 : index
    %68 = vector.load %arg2[%c6, %c0_23, %c0_24] : memref<8x8x128xf32, #tpu.memory_space<vmem>>, vector<1x8x128xf32>
    %69 = vector.shape_cast %68 : vector<1x8x128xf32> to vector<8x128xf32>
    %70 = vector.shape_cast %67 : vector<8x128xf32> to vector<1x8x128xf32>
    tpu.vector_store %arg2[%c6, %c0_23, %c0_24], %70 {strides = array<i32>} : memref<8x8x128xf32, #tpu.memory_space<vmem>>, vector<1x8x128xf32>,
    %71 = arith.mulf %29, %66 : vector<8x128xf32>
    %72 = arith.subf %71, %60 : vector<8x128xf32>
    %73 = arith.mulf %72, %23 : vector<8x128xf32>
    %c7 = arith.constant 7 : index
    %c0_25 = arith.constant 0 : index
    %c0_26 = arith.constant 0 : index
    %74 = vector.load %arg2[%c7, %c0_25, %c0_26] : memref<8x8x128xf32, #tpu.memory_space<vmem>>, vector<1x8x128xf32>
    %75 = vector.shape_cast %74 : vector<1x8x128xf32> to vector<8x128xf32>
    %76 = vector.shape_cast %73 : vector<8x128xf32> to vector<1x8x128xf32>
    tpu.vector_store %arg2[%c7, %c0_25, %c0_26], %76 {strides = array<i32>} : memref<8x8x128xf32, #tpu.memory_space<vmem>>, vector<1x8x128xf32>,
    return
  }
  func.func @transform_0(%arg0: i32) -> (i32, i32) {
    %c0_i32 = arith.constant 0 : i32
    %c0_i32_0 = arith.constant 0 : i32
    return %arg0, %c0_i32 : i32, i32
  }
  func.func @transform_1(%arg0: i32) -> (i32, i32, i32) {
    %c0_i32 = arith.constant 0 : i32
    %c0_i32_0 = arith.constant 0 : i32
    %c0_i32_1 = arith.constant 0 : i32
    return %c0_i32, %arg0, %c0_i32_0 : i32, i32, i32
  }
}

</mosaic_0001>

<bundles_post_ra>
// kernel: tpu_custom_call.1
= control target key start
LH: loop header
LB: loop body
LE: loop exit
PB: predicated region body
PF: predicated region fallthrough
CT: control target
= control target key end

     0   :  { %6 = vsyncpa [#allocation3], 0  ;;  %s432_s0 = inlined_call_operand.hbm [shape: f32[8,128], index: 0, kind: input, shape index: {}]   ;;  %s433_s1 = inlined_call_operand.hbm [shape: f32[8,8,128], index: 1, kind: output, shape index: {}]  }
   0x1   :  { %7 = vsyncpa [#allocation4], 0  ;;  %s375_s6 = smov [#allocation2]  }
   0x2   :  { %s14_s7 = sshll.u32 %s375_s6, 4  ;;  %s15_s7 = int_to_ptr.vmem [resolvable:$true] %s14_s7 }
   0x3   :  { %s339_s8 = scalar_lea.vmem %s15_s7, 128  ;;  %p344_p1 = scmp.lt.s32.totalorder %s15_s7, %s15_s7 }
   0x4   :  { %p340_p0 = scmp.ne.s32.totalorder %s15_s7, %s339_s8  ;;  %p345_p2 = scmp.lt.s32.totalorder %s339_s8, %s339_s8 }
   0x6   :  { %p346_p3 = por %p345_p2, %p344_p1 }
   0x8   :  { %p347_p4 = pnand %p346_p3, %p340_p0 }
   0xa   :  { %350 = shalt.err (!%p347_p4)
}
   0xb   :  { %17 = dma.hbm_to_vmem [thread:$0]  %s432_s0, 128, %s15_s7, [#allocation3]  }
   0xc   :  { %371 = dma.done.wait [#allocation3], 128  }
   0xd   :  { %372 = vsyncadd [#allocation3], 4294967168  ;;  %v399_v0 = vld [vmem:[#allocation2] sm:$0xff]  ;;  %v376_v13 = vmov 683565275   ;;  %s383_s0 = smov [#allocation5]  }
   0xe   :  { %v402_v1 = vmul.f32 0.62831855, %v399_v0  ;;  %v377_v15 = vmov 2475754826   ;;  %v378_v17 = vmov 2131351028   ;;  %325 = vrcp.f32 %v399_v0 }
   0xf   :  { %v379_v19 = vmov 2102212464   ;;  %v380_v21 = vmov 920167782   ;;  %v381_v28 = vmov 1326507024  }
  0x10   :  { %v43_v2 = vand.u32 2139095040, %v402_v1  ;;  %v40_v4 = vand.u32 2147483647, %v402_v1  ;;  %v22_v63 = vmul.f32 0.2, %v399_v0  ;;  %vm42_vm7 = vcmp.lt.s32.totalorder %v402_v1, 0 }
  0x11   :  { %vm32_vm9 = vcmp.lt.f32.partialorder %v399_v0, 5.0  ;;  %s289_s11 = sshll.u32 %s383_s0, 4  ;;  %s290_s11 = int_to_ptr.vmem [resolvable:$true] %s289_s11 }
  0x12   :  { %v44_v3 = vshrl.u32 %v43_v2, 23  ;;  %v47_v7 = vand.u32 8388607, %v40_v4  ;;  %vm41_vm8 = vcmp.le.f32.partialorder %v40_v4, 0.7853982  ;;  %s351_s12 = scalar_lea.vmem %s290_s11, 1024  ;;  %p356_p6 = scmp.lt.s32.totalorder %s290_s11, %s290_s11 }
  0x13   :  { %p352_p5 = scmp.ne.s32.totalorder %s290_s11, %s351_s12  ;;  %p357_p7 = scmp.lt.s32.totalorder %s351_s12, %s351_s12 }
  0x14   :  { %v302_v5 = vadd.s32 4294967169, %v44_v3  ;;  %v48_v10 = vor.u32 8388608, %v47_v7 }
  0x15   :  { %p358_p8 = por %p357_p7, %p356_p6 }
  0x16   :  { %v50_v6 = vadd.s32 1, %v302_v5  ;;  %v88_v30 = vshll.u32 %v48_v10, 8 }
  0x17   :  { %p359_p9 = pnand %p358_p8, %p352_p5 }
  0x18   :  { %vm51_vm0 = vcmp.gt.s32.totalorder %v50_v6, 0 }
  0x19   :  { %v52_v8 = vsel %vm51_vm0, %v50_v6, 0  ;;  %v26_v6 = vmul.f32 21.0, %v22_v63  ;;  %vm132_vm0 = vweird.f32 %v402_v1 }
  0x1a   :  { %v54_v9 = vand.u32 31, %v52_v8  ;;  %v53_v11 = vshrl.u32 %v52_v8, 5 }
  0x1c   :  { %v55_v12 = vsub.s32 32, %v54_v9  ;;  %v57_v14 = vshll.u32 %v376_v13, %v54_v9  ;;  %v60_v16 = vshll.u32 %v377_v15, %v54_v9  ;;  %v63_v18 = vshll.u32 %v378_v17, %v54_v9 }
  0x1d   :  { %v66_v20 = vshll.u32 %v379_v19, %v54_v9  ;;  %v69_v22 = vshll.u32 %v380_v21, %v54_v9  ;;  %vm72_vm1 = vcmp.lt.s32.totalorder %v53_v11, 1  ;;  %vm73_vm2 = vcmp.lt.s32.totalorder %v53_v11, 2 }
  0x1e   :  { %v56_v23 = vshrl.u32 %v376_v13, %v55_v12  ;;  %v58_v24 = vshrl.u32 %v377_v15, %v55_v12  ;;  %v61_v25 = vshrl.u32 %v378_v17, %v55_v12  ;;  %v64_v26 = vshrl.u32 %v379_v19, %v55_v12 }
  0x1f   :  { %v67_v27 = vshrl.u32 %v380_v21, %v55_v12  ;;  %v70_v29 = vshrl.u32 %v381_v28, %v55_v12  ;;  %vm74_vm3 = vcmp.lt.s32.totalorder %v53_v11, 3  ;;  %vm75_vm4 = vcmp.lt.s32.totalorder %v53_v11, 4 }
  0x20   :  { %v59_v31 = vor.u32 %v58_v24, %v57_v14  ;;  %v62_v32 = vor.u32 %v61_v25, %v60_v16  ;;  %v65_v33 = vor.u32 %v64_v26, %v63_v18  ;;  %v23_v12 = vmul.f32 %v22_v63, %v22_v63 }
  0x21   :  { %v68_v34 = vor.u32 %v67_v27, %v66_v20  ;;  %v71_v35 = vor.u32 %v70_v29, %v69_v22  ;;  %v27_v13 = vsub.f32 48.0, %v26_v6 }
  0x22   :  { %v76_v36 = vsel %vm72_vm1, %v56_v23, %v59_v31  ;;  %v77_v37 = vsel %vm75_vm4, %v65_v33, 2102212464  ;;  %v80_v38 = vsel %vm72_vm1, %v59_v31, %v62_v32  ;;  %v84_v39 = vsel %vm72_vm1, %v62_v32, %v65_v33 }
  0x23   :  { %v78_v40 = vsel %vm74_vm3, %v62_v32, %v77_v37  ;;  %v81_v41 = vsel %vm75_vm4, %v68_v34, 920167782  ;;  %v85_v42 = vsel %vm75_vm4, %v71_v35, 1326507024  ;;  %v24_v18 = vmul.f32 %v23_v12, %v23_v12  ;;  %v326_v37 = vpop.eup %325 }
  0x24   :  { %v82_v43 = vsel %vm74_vm3, %v65_v33, %v81_v41  ;;  %v86_v44 = vsel %vm74_vm3, %v68_v34, %v85_v42  ;;  %v79_v45 = vsel %vm73_vm2, %v76_v36, %v78_v40  ;;  %v28_v19 = vmul.f32 %v27_v13, %v22_v63 }
  0x25   :  { %v83_v46 = vsel %vm73_vm2, %v80_v38, %v82_v43  ;;  %v87_v47 = vsel %vm73_vm2, %v84_v39, %v86_v44  ;;  %v95_v52 = vmul.u32 %v88_v30, %v79_v45  ;;  %v25_v23 = vmul.f32 %v24_v18, %v23_v12 }
  0x26   :  { %v411_v48 = vmul.u32.u64.low %v88_v30, %v87_v47  ;;  %v412_v49 = vmul.u32.u64.high %v88_v30, %v87_v47, %v411_v48  ;;  %v414_v50 = vmul.u32.u64.low %v88_v30, %v83_v46  ;;  %v415_v51 = vmul.u32.u64.high %v88_v30, %v83_v46, %v414_v50 }
  0x27   :  { %v29_v24 = vadd.f32 -28.0, %v28_v19  ;;  %v382_v34 = vmov 0.0  }
  0x28   :  { %vm97_vm5 = vc.u32 %v412_v49, %v414_v50  ;;  %v98_v53 = vadd.s32 1, %v415_v51  ;;  %v96_v3 = vadd.s32 %v414_v50, %v412_v49  ;;  %v301_v35 = vsel %vm32_vm9, 1.0, %v382_v34 }
  0x29   :  { %v30_v29 = vmul.f32 %v29_v24, %v25_v23 }
  0x2a   :  { %v99_v54 = vsel %vm97_vm5, %v98_v53, %v415_v51 }
  0x2b   :  { %v100_v55 = vadd.s32 %v99_v54, %v95_v52  ;;  %v31_v31 = vadd.f32 1.0, %v30_v29 }
  0x2d   :  { %v101_v56 = vadd.s32 536870912, %v100_v55  ;;  %v35_v33 = vmul.f32 0.6324555, %v31_v31 }
  0x2f   :  { %v102_v57 = vshrl.u32 %v101_v56, 30  ;;  %v36_v38 = vmul.f32 %v301_v35, %v35_v33 }
  0x31   :  { %v103_v58 = vshll.u32 %v102_v57, 30  ;;  %v126_v22 = vsub.s32 4, %v102_v57  ;;  %v38_v43 = vmul.f32 %v326_v37, %v36_v38 }
  0x33   :  { %v104_v59 = vsub.s32 %v100_v55, %v103_v58  ;;  %v127_v27 = vsel %vm42_vm7, %v126_v22, %v102_v57 }
  0x34   :  { %v129_v30 = vsel %vm41_vm8, 0, %v127_v27 }
  0x35   :  { %v106_v60 = vsub.s32 0, %v104_v59  ;;  %v133_v32 = vadd.s32 3, %v129_v30  ;;  %v237_v4 = vand.u32 3, %v129_v30 }
  0x37   :  { %v303_v61 = vmin.u32 %v106_v60, %v104_v59  ;;  %v134_v36 = vand.u32 3, %v133_v32  ;;  %vm242_vm11 = vcmp.eq.s32.totalorder %v237_v4, 2  ;;  %vm239_vm13 = vcmp.eq.s32.totalorder %v237_v4, 0 }
  0x38   :  { %vm238_vm15 = vcmp.lt.s32.totalorder %v237_v4, 2 }
  0x39   :  { %v108_v62 = vclz %v303_v61  ;;  %vm139_vm10 = vcmp.eq.s32.totalorder %v134_v36, 2  ;;  %vm136_vm12 = vcmp.eq.s32.totalorder %v134_v36, 0  ;;  %vm135_vm14 = vcmp.lt.s32.totalorder %v134_v36, 2 }
  0x3b   :  { %v304_v2 = vadd.s32 4294967294, %v108_v62 }
  0x3d   :  { %vm305_vm6 = vcmp.lt.s32.totalorder %v304_v2, 0 }
  0x3e   :  { %v111_v5 = vsel %vm305_vm6, 0, %v304_v2 }
  0x3f   :  { %v112_v7 = vsub.s32 32, %v111_v5  ;;  %v113_v8 = vshll.u32 %v104_v59, %v111_v5  ;;  %v116_v9 = vsub.s32 4294967266, %v111_v5 }
  0x41   :  { %v114_v10 = vshrl.u32 %v96_v3, %v112_v7  ;;  %v117_v11 = vadd.s32 127, %v116_v9 }
  0x43   :  { %v115_v14 = vor.u32 %v114_v10, %v113_v8  ;;  %v118_v15 = vshll.u32 %v117_v11, 23 }
  0x45   :  { %v119_v16 = vor.u32 4788187, %v118_v15  ;;  %v122_v17 = vcvt.s32.f32 %v115_v14 }
  0x47   :  { %v120_v20 = vand.u32 2147483647, %v119_v16 }
  0x49   :  { %v123_v21 = vmul.f32 %v122_v17, %v120_v20 }
  0x4b   :  { %v124_v25 = vxor.u32 2147483648, %v123_v21 }
  0x4d   :  { %v125_v26 = vsel %vm42_vm7, %v124_v25, %v123_v21 }
  0x4e   :  { %v128_v28 = vsel %vm41_vm8, %v402_v1, %v125_v26 }
  0x4f   :  { %327 = vcosq.f32 %v128_v28 }
  0x50   :  { %329 = vsinq.f32 %v128_v28 }
  0x5c   :  { %v328_v39 = vpop.eup %327 }
  0x5d   :  { %v330_v40 = vpop.eup %329  ;;  %v140_v41 = vxor.u32 2147483648, %v328_v39 }
  0x5e   :  { %v137_v42 = vxor.u32 2147483648, %v330_v40 }
  0x5f   :  { %v141_v0 = vsel %vm139_vm10, %v140_v41, %v330_v40  ;;  %v244_v44 = vsel %vm242_vm11, %v140_v41, %v330_v40 }
  0x60   :  { %v138_v45 = vsel %vm136_vm12, %v328_v39, %v137_v42  ;;  %v241_v46 = vsel %vm239_vm13, %v328_v39, %v137_v42 }
  0x61   :  { %v142_v47 = vsel %vm135_vm14, %v138_v45, %v141_v0  ;;  %v245_v48 = vsel %vm238_vm15, %v241_v46, %v244_v44 }
  0x62   :  { %v143_v49 = vsel %vm132_vm0, nan, %v142_v47  ;;  %v246_v50 = vsel %vm132_vm0, nan, %v245_v48 }
  0x63   :  { %v247_v51 = vmul.f32 2.0, %v246_v50  ;;  %v248_v52 = vmul.f32 %v143_v49, %v38_v43 }
  0x65   :  { %249 = vst [vmem:[#allocation5] sm:$0xff] %v248_v52  ;;  %v250_v53 = vmul.f32 %v247_v51, %v143_v49 }
  0x67   :  { %v251_v54 = vmul.f32 %v250_v53, %v38_v43  ;;  %v254_v55 = vmul.f32 %v250_v53, %v247_v51 }
  0x69   :  { %253 = vst [vmem:[#allocation5 + $0x8] sm:$0xff] %v251_v54  ;;  %v255_v56 = vsub.f32 %v254_v55, %v143_v49 }
  0x6b   :  { %v256_v57 = vmul.f32 %v255_v56, %v38_v43  ;;  %v259_v58 = vmul.f32 %v255_v56, %v247_v51 }
  0x6d   :  { %258 = vst [vmem:[#allocation5 + $0x10] sm:$0xff] %v256_v57  ;;  %v260_v1 = vsub.f32 %v259_v58, %v250_v53 }
  0x6f   :  { %v261_v59 = vmul.f32 %v260_v1, %v38_v43  ;;  %v264_v60 = vmul.f32 %v260_v1, %v247_v51 }
  0x71   :  { %263 = vst [vmem:[#allocation5 + $0x18] sm:$0xff] %v261_v59  ;;  %v265_v61 = vsub.f32 %v264_v60, %v255_v56 }
  0x73   :  { %v266_v62 = vmul.f32 %v265_v61, %v38_v43  ;;  %v269_v63 = vmul.f32 %v265_v61, %v247_v51 }
  0x75   :  { %268 = vst [vmem:[#allocation5 + $0x20] sm:$0xff] %v266_v62  ;;  %v270_v2 = vsub.f32 %v269_v63, %v260_v1 }
  0x77   :  { %v271_v3 = vmul.f32 %v270_v2, %v38_v43  ;;  %v274_v5 = vmul.f32 %v270_v2, %v247_v51 }
  0x79   :  { %273 = vst [vmem:[#allocation5 + $0x28] sm:$0xff] %v271_v3  ;;  %v275_v6 = vsub.f32 %v274_v5, %v265_v61 }
  0x7b   :  { %v276_v7 = vmul.f32 %v275_v6, %v38_v43  ;;  %v279_v8 = vmul.f32 %v275_v6, %v247_v51 }
  0x7d   :  { %278 = vst [vmem:[#allocation5 + $0x30] sm:$0xff] %v276_v7  ;;  %v280_v9 = vsub.f32 %v279_v8, %v270_v2 }
  0x7f   :  { %v281_v10 = vmul.f32 %v280_v9, %v38_v43 }
  0x81   :  { %283 = vst [vmem:[#allocation5 + $0x38] sm:$0xff] %v281_v10 }
  0x82   :  { %362 = shalt.err (!%p359_p9)
}
  0x83   :  { %s384_s13 = smov 128   ;;  %s385_s14 = smov 8  }
  0x84   :  { %295 = dma.vmem_to_hbm [thread:$0]  %s290_s11, 1024, %s433_s1, [#allocation4], %s384_s13, %s384_s13, %s385_s14  }
  0x85   :  { %373 = dma.done.wait [#allocation4], 1024  }
  0x86   :  { %374 = vsyncadd [#allocation4], 4294966272 }
  0x87   :  { %299 = vsyncpa [#allocation3], 1 }
  0x88   :  { %300 = vsyncpa [#allocation4], 1 }

</bundles_post_ra>
